<compile_context>
chip_gen: v7x
topology: tpu7x:2x2x1
jax: 0.10.0
libtpu: 0.0.40
codegen_flags: <defaults>
</compile_context>

<pallas_src>
import functools
import math

import jax
import jax.numpy as jnp
from jax import lax
from jax.experimental import pallas as pl
from jax.experimental.pallas import tpu as pltpu

F32 = jnp.float32
BF16 = jnp.bfloat16
_NEG = -1e30  # large finite negative for the additive causal mask (no -inf -> no NaN risk)


# ----------------------------- in-kernel helpers -----------------------------

def _layer_norm(x, w, b, eps=1e-5):
    mu = jnp.mean(x, axis=-1, keepdims=True)
    var = jnp.mean((x - mu) ** 2, axis=-1, keepdims=True)
    return (x - mu) * lax.rsqrt(var + eps) * w + b


def _gelu_tanh(x):
    # matches nn.GELU(approximate='tanh')
    c = math.sqrt(2.0 / math.pi)
    return 0.5 * x * (1.0 + jnp.tanh(c * (x + 0.044715 * x * x * x)))


def _nbytes(shape, dtype):
    n = 1
    for d in shape:
        n *= d
    return n * jnp.dtype(dtype).itemsize


def _vmem_limit(block_bytes):
    # double-buffered blocks + headroom, clamped to be safe on v7x (64 MiB VMEM)
    return int(min(max(2 * block_bytes + (8 << 20), 16 << 20), 64 << 20))


def _seq_tile(T):
    for t in (256, 128):
        if T > t and T % t == 0:
            return t
    return T


def _vocab_tile(V):
    for t in (2048, 1024, 512, 256, 128):
        if V > t and V % t == 0:
            return t
    return V


# ----------------------------- attention kernel ------------------------------

def _attn_kernel(n_head, x_ref, ln1w_ref, ln1b_ref, wqkv_ref, bqkv_ref,
                 wproj_ref, bproj_ref, o_ref):
    x = x_ref[0]                                   # (T, C) f32
    T, C = x.shape
    hd = C // n_head
    scale = 1.0 / math.sqrt(hd)

    h = _layer_norm(x, ln1w_ref[0], ln1b_ref[0])   # f32 (VPU/EUP path)
    qkv = jnp.dot(h.astype(BF16), wqkv_ref[...],   # bf16 MXU, f32 accumulate
                  preferred_element_type=F32) + bqkv_ref[0]   # (T, 3C) f32

    # head-batched (H, T, hd) layout, bf16 MXU operands
    def heads(off):
        return jnp.stack(
            [qkv[:, off + hh * hd: off + (hh + 1) * hd] for hh in range(n_head)],
            axis=0).astype(BF16)

    q = heads(0)
    k = heads(C)
    v = heads(2 * C)

    row = lax.broadcasted_iota(jnp.int32, (T, T), 0)
    col = lax.broadcasted_iota(jnp.int32, (T, T), 1)
    mask = jnp.where(col <= row, 0.0, _NEG).astype(F32)       # additive causal mask

    s = jnp.einsum("hqd,hkd->hqk", q, k,
                   preferred_element_type=F32) * scale + mask[None]
    m = jnp.max(s, axis=-1, keepdims=True)
    e = jnp.exp(s - m)                                        # f32 on EUP
    p = e * pl.reciprocal(jnp.sum(e, axis=-1, keepdims=True), approx=True)
    y = jnp.einsum("hqk,hkd->hqd", p.astype(BF16), v,
                   preferred_element_type=F32)                # (H, T, hd) f32

    # lane-dense (T, C) value (no narrow masked scratch stores)
    y = jnp.concatenate([y[hh] for hh in range(n_head)], axis=-1)
    attn = jnp.dot(y.astype(BF16), wproj_ref[...],
                   preferred_element_type=F32) + bproj_ref[0]
    o_ref[0] = x + attn


def run_attention(x, blk, n_head):
    B, T, C = x.shape
    blocks = [((1, T, C), F32), ((1, C), F32), ((1, C), F32),
              ((C, 3 * C), BF16), ((1, 3 * C), F32),
              ((C, C), BF16), ((1, C), F32), ((1, T, C), F32)]
    limit = _vmem_limit(sum(_nbytes(s, d) for s, d in blocks))
    kernel = functools.partial(_attn_kernel, n_head)
    return pl.pallas_call(
        kernel,
        out_shape=jax.ShapeDtypeStruct((B, T, C), F32),
        grid=(B,),
        in_specs=[
            pl.BlockSpec((1, T, C), lambda b: (b, 0, 0)),   # x
            pl.BlockSpec((1, C), lambda b: (0, 0)),         # ln1 w
            pl.BlockSpec((1, C), lambda b: (0, 0)),         # ln1 b
            pl.BlockSpec((C, 3 * C), lambda b: (0, 0)),     # c_attn W (bf16)
            pl.BlockSpec((1, 3 * C), lambda b: (0, 0)),     # c_attn b
            pl.BlockSpec((C, C), lambda b: (0, 0)),         # c_proj W (bf16)
            pl.BlockSpec((1, C), lambda b: (0, 0)),         # c_proj b
        ],
        out_specs=pl.BlockSpec((1, T, C), lambda b: (b, 0, 0)),
        compiler_params=pltpu.CompilerParams(
            dimension_semantics=("parallel",),
            vmem_limit_bytes=limit),
    )(x, blk["ln1_w"], blk["ln1_b"], blk["w_attn"], blk["b_attn"],
      blk["w_proj"], blk["b_proj"])


# -------------------------------- MLP kernel ---------------------------------

def _mlp_kernel(x_ref, ln2w_ref, ln2b_ref, wfc_ref, bfc_ref,
                wfc2_ref, bfc2_ref, o_ref):
    x = x_ref[0]                                   # (tq, C) f32
    h = _layer_norm(x, ln2w_ref[0], ln2b_ref[0])
    fc = jnp.dot(h.astype(BF16), wfc_ref[...],
                 preferred_element_type=F32) + bfc_ref[0]
    g = _gelu_tanh(fc)                             # f32
    mlp = jnp.dot(g.astype(BF16), wfc2_ref[...],
                  preferred_element_type=F32) + bfc2_ref[0]
    o_ref[0] = x + mlp


def run_mlp(x, blk):
    B, T, C = x.shape
    tq = _seq_tile(T)
    blocks = [((1, tq, C), F32), ((1, C), F32), ((1, C), F32),
              ((C, 4 * C), BF16), ((1, 4 * C), F32),
              ((4 * C, C), BF16), ((1, C), F32), ((1, tq, C), F32)]
    limit = _vmem_limit(sum(_nbytes(s, d) for s, d in blocks))
    return pl.pallas_call(
        _mlp_kernel,
        out_shape=jax.ShapeDtypeStruct((B, T, C), F32),
        grid=(B, T // tq),
        in_specs=[
            pl.BlockSpec((1, tq, C), lambda b, t: (b, t, 0)),   # x tile
            pl.BlockSpec((1, C), lambda b, t: (0, 0)),          # ln2 w
            pl.BlockSpec((1, C), lambda b, t: (0, 0)),          # ln2 b
            pl.BlockSpec((C, 4 * C), lambda b, t: (0, 0)),      # c_fc W (bf16)
            pl.BlockSpec((1, 4 * C), lambda b, t: (0, 0)),      # c_fc b
            pl.BlockSpec((4 * C, C), lambda b, t: (0, 0)),      # c_proj W (bf16)
            pl.BlockSpec((1, C), lambda b, t: (0, 0)),          # c_proj b
        ],
        out_specs=pl.BlockSpec((1, tq, C), lambda b, t: (b, t, 0)),
        compiler_params=pltpu.CompilerParams(
            dimension_semantics=("parallel", "parallel"),
            vmem_limit_bytes=limit),
    )(x, blk["ln2_w"], blk["ln2_b"], blk["w_fc"], blk["b_fc"],
      blk["w_fc2"], blk["b_fc2"])


# ------------------------- final LN + tied LM head ----------------------------

def _head_kernel(x_ref, lnfw_ref, lnfb_ref, w_ref, o_ref):
    x = x_ref[0]                                   # (T, C) f32
    h = _layer_norm(x, lnfw_ref[0], lnfb_ref[0]).astype(BF16)
    # tied weight tile is (tv, C); contract C against C (trans-B on the MXU),
    # so no transposed copy of wte is ever materialized.
    o_ref[0] = lax.dot_general(
        h, w_ref[...],
        dimension_numbers=(((1,), (1,)), ((), ())),
        preferred_element_type=F32)


def run_head(x, lnf_w, lnf_b, wte_bf16):
    B, T, C = x.shape
    V = wte_bf16.shape[0]
    tv = _vocab_tile(V)
    blocks = [((1, T, C), F32), ((1, C), F32), ((1, C), F32),
              ((tv, C), BF16), ((1, T, tv), F32)]
    limit = _vmem_limit(sum(_nbytes(s, d) for s, d in blocks))
    return pl.pallas_call(
        _head_kernel,
        out_shape=jax.ShapeDtypeStruct((B, T, V), F32),
        grid=(B, V // tv),
        in_specs=[
            pl.BlockSpec((1, T, C), lambda b, j: (b, 0, 0)),    # hidden states
            pl.BlockSpec((1, C), lambda b, j: (0, 0)),          # ln_f w
            pl.BlockSpec((1, C), lambda b, j: (0, 0)),          # ln_f b
            pl.BlockSpec((tv, C), lambda b, j: (j, 0)),         # wte vocab tile (bf16)
        ],
        out_specs=pl.BlockSpec((1, T, tv), lambda b, j: (b, 0, j)),
        compiler_params=pltpu.CompilerParams(
            dimension_semantics=("parallel", "parallel"),
            vmem_limit_bytes=limit),
    )(x, lnf_w, lnf_b, wte_bf16)


# ---------------------------------- model -------------------------------------

def init_params(key, *, vocab_size, block_size, n_layer, n_embd):
    C = n_embd
    keys = jax.random.split(key, 2 + 4 * n_layer)
    ki = iter(keys)
    wte = 0.02 * jax.random.normal(next(ki), (vocab_size, C), F32)
    p = {
        "wte": wte,                       # (V, C) f32, used for the embedding gather
        "wte_bf16": wte.astype(BF16),     # tied lm_head weight, materialized once at init
        "wpe": 0.02 * jax.random.normal(next(ki), (block_size, C), F32),
        "lnf_w": jnp.ones((1, C), F32),
        "lnf_b": jnp.zeros((1, C), F32),
        "blocks": [],
    }
    for _ in range(n_layer):
        blk = {
            "ln1_w": jnp.ones((1, C), F32),
            "ln1_b": jnp.zeros((1, C), F32),
            "w_attn": (0.02 * jax.random.normal(next(ki), (C, 3 * C), F32)).astype(BF16),
            "b_attn": jnp.zeros((1, 3 * C), F32),
            "w_proj": (0.02 * jax.random.normal(next(ki), (C, C), F32)).astype(BF16),
            "b_proj": jnp.zeros((1, C), F32),
            "ln2_w": jnp.ones((1, C), F32),
            "ln2_b": jnp.zeros((1, C), F32),
            "w_fc": (0.02 * jax.random.normal(next(ki), (C, 4 * C), F32)).astype(BF16),
            "b_fc": jnp.zeros((1, 4 * C), F32),
            "w_fc2": (0.02 * jax.random.normal(next(ki), (4 * C, C), F32)).astype(BF16),
            "b_fc2": jnp.zeros((1, C), F32),
        }
        p["blocks"].append(blk)
    return p


def gpt_forward(tokens, params, n_head):
    B, T = tokens.shape
    tok_emb = params["wte"][tokens]                 # (B, T, C) gather (plain-JAX glue)
    pos_emb = params["wpe"][:T]                     # (T, C)
    x = (tok_emb + pos_emb[None, :, :]).astype(F32)
    for blk in params["blocks"]:
        x = run_attention(x, blk, n_head)           # x + attn(ln1(x))
        x = run_mlp(x, blk)                         # x + mlp(ln2(x))
    # tied weights: logits = ln_f(x) @ wte.T  (trans-B inside the kernel)
    return run_head(x, params["lnf_w"], params["lnf_b"], params["wte_bf16"])


# ----------------------------------- main --------------------------------------

if __name__ == "__main__":
    # small config consistent with the module's forward
    B, T = 2, 8
    vocab_size, block_size = 64, 16
    n_layer, n_head, n_embd = 2, 4, 32

    key = jax.random.PRNGKey(0)
    pkey, tkey = jax.random.split(key)
    params = init_params(pkey, vocab_size=vocab_size, block_size=block_size,
                         n_layer=n_layer, n_embd=n_embd)
    tokens = jax.random.randint(tkey, (B, T), 0, vocab_size, dtype=jnp.int32)

    logits = gpt_forward(tokens, params, n_head)
    logits = jax.block_until_ready(logits)

    assert logits.shape == (B, T, vocab_size), logits.shape
    assert bool(jnp.all(jnp.isfinite(logits)))
    print("KERNEL_OK")
</pallas_src>

<mosaic_0001>
module attributes {stable_mosaic.version = 11 : i64} {
  func.func @_attn_kernel(%arg0: i32, %arg1: memref<1x8x32xf32, #tpu.memory_space<vmem>>, %arg2: memref<1x32xf32, #tpu.memory_space<vmem>>, %arg3: memref<1x32xf32, #tpu.memory_space<vmem>>, %arg4: memref<32x96xbf16, #tpu.memory_space<vmem>>, %arg5: memref<1x96xf32, #tpu.memory_space<vmem>>, %arg6: memref<32x32xbf16, #tpu.memory_space<vmem>>, %arg7: memref<1x32xf32, #tpu.memory_space<vmem>>, %arg8: memref<1x8x32xf32, #tpu.memory_space<vmem>>) attributes {dimension_semantics = [#tpu.dimension_semantics<parallel>], iteration_bounds = array<i64: 2>, scalar_prefetch = 0 : i64, scratch_operands = 0 : i64, tpu.core_type = #tpu.core_type<tc>, window_params = [{transform_indices = @transform_0, window_bounds = array<i64: 1, 8, 32>}, {pipeline_mode = #tpu.pipeline_mode<synchronous>, transform_indices = @transform_1, window_bounds = array<i64: 1, 32>}, {pipeline_mode = #tpu.pipeline_mode<synchronous>, transform_indices = @transform_2, window_bounds = array<i64: 1, 32>}, {pipeline_mode = #tpu.pipeline_mode<synchronous>, transform_indices = @transform_3, window_bounds = array<i64: 32, 96>}, {pipeline_mode = #tpu.pipeline_mode<synchronous>, transform_indices = @transform_4, window_bounds = array<i64: 1, 96>}, {pipeline_mode = #tpu.pipeline_mode<synchronous>, transform_indices = @transform_5, window_bounds = array<i64: 32, 32>}, {pipeline_mode = #tpu.pipeline_mode<synchronous>, transform_indices = @transform_6, window_bounds = array<i64: 1, 32>}, {transform_indices = @transform_7, window_bounds = array<i64: 1, 8, 32>}]} {
    %c0 = arith.constant 0 : index
    %c0_0 = arith.constant 0 : index
    %c0_1 = arith.constant 0 : index
    %0 = vector.load %arg1[%c0, %c0_0, %c0_1] : memref<1x8x32xf32, #tpu.memory_space<vmem>>, vector<1x8x32xf32>
    %1 = vector.shape_cast %0 : vector<1x8x32xf32> to vector<8x32xf32>
    %c0_2 = arith.constant 0 : index
    %c0_3 = arith.constant 0 : index
    %2 = vector.load %arg2[%c0_2, %c0_3] : memref<1x32xf32, #tpu.memory_space<vmem>>, vector<1x32xf32>
    %3 = vector.shape_cast %2 : vector<1x32xf32> to vector<32xf32>
    %c0_4 = arith.constant 0 : index
    %c0_5 = arith.constant 0 : index
    %4 = vector.load %arg3[%c0_4, %c0_5] : memref<1x32xf32, #tpu.memory_space<vmem>>, vector<1x32xf32>
    %5 = vector.shape_cast %4 : vector<1x32xf32> to vector<32xf32>
    %cst = arith.constant dense<0.000000e+00> : vector<8xf32>
    %6 = vector.multi_reduction <add>, %1, %cst [1] : vector<8x32xf32> to vector<8xf32>
    %7 = vector.shape_cast %6 : vector<8xf32> to vector<8x1xf32>
    %cst_6 = arith.constant 3.200000e+01 : f32
    %8 = vector.broadcast %cst_6 : f32 to vector<8x1xf32>
    %9 = arith.divf %7, %8 : vector<8x1xf32>
    %10 = vector.broadcast %9 : vector<8x1xf32> to vector<8x32xf32>
    %11 = arith.subf %1, %10 : vector<8x32xf32>
    %12 = arith.mulf %11, %11 : vector<8x32xf32>
    %cst_7 = arith.constant dense<0.000000e+00> : vector<8xf32>
    %13 = vector.multi_reduction <add>, %12, %cst_7 [1] : vector<8x32xf32> to vector<8xf32>
    %14 = vector.shape_cast %13 : vector<8xf32> to vector<8x1xf32>
    %cst_8 = arith.constant 3.200000e+01 : f32
    %15 = vector.broadcast %cst_8 : f32 to vector<8x1xf32>
    %16 = arith.divf %14, %15 : vector<8x1xf32>
    %17 = vector.broadcast %9 : vector<8x1xf32> to vector<8x32xf32>
    %18 = arith.subf %1, %17 : vector<8x32xf32>
    %cst_9 = arith.constant 9.99999974E-6 : f32
    %19 = vector.broadcast %cst_9 : f32 to vector<8x1xf32>
    %20 = arith.addf %16, %19 : vector<8x1xf32>
    %21 = math.rsqrt %20 : vector<8x1xf32>
    %22 = vector.broadcast %21 : vector<8x1xf32> to vector<8x32xf32>
    %23 = arith.mulf %18, %22 : vector<8x32xf32>
    %24 = vector.shape_cast %3 : vector<32xf32> to vector<1x32xf32>
    %25 = vector.broadcast %24 : vector<1x32xf32> to vector<8x32xf32>
    %26 = arith.mulf %23, %25 : vector<8x32xf32>
    %27 = vector.shape_cast %5 : vector<32xf32> to vector<1x32xf32>
    %28 = vector.broadcast %27 : vector<1x32xf32> to vector<8x32xf32>
    %29 = arith.addf %26, %28 : vector<8x32xf32>
    %30 = arith.truncf %29 : vector<8x32xf32> to vector<8x32xbf16>
    %c0_10 = arith.constant 0 : index
    %c0_11 = arith.constant 0 : index
    %31 = vector.load %arg4[%c0_10, %c0_11] : memref<32x96xbf16, #tpu.memory_space<vmem>>, vector<32x96xbf16>
    %cst_12 = arith.constant dense<0.000000e+00> : vector<8x96xf32>
    %32 = tpu.matmul %30, %31, %cst_12 {dimension_numbers = #tpu.dot_dimension_numbers<[1], [0], [0], [1], [0, 0, 1, 1], [], []>} : vector<8x32xbf16>, vector<32x96xbf16>, vector<8x96xf32> -> vector<8x96xf32>
    %c0_13 = arith.constant 0 : index
    %c0_14 = arith.constant 0 : index
    %33 = vector.load %arg5[%c0_13, %c0_14] : memref<1x96xf32, #tpu.memory_space<vmem>>, vector<1x96xf32>
    %34 = vector.shape_cast %33 : vector<1x96xf32> to vector<96xf32>
    %35 = vector.shape_cast %34 : vector<96xf32> to vector<1x96xf32>
    %36 = vector.broadcast %35 : vector<1x96xf32> to vector<8x96xf32>
    %37 = arith.addf %32, %36 : vector<8x96xf32>
    %38 = vector.extract_strided_slice %37 {offsets = [0, 0], sizes = [8, 8], strides = [1, 1]} : vector<8x96xf32> to vector<8x8xf32>
    %39 = vector.extract_strided_slice %37 {offsets = [0, 8], sizes = [8, 8], strides = [1, 1]} : vector<8x96xf32> to vector<8x8xf32>
    %40 = vector.extract_strided_slice %37 {offsets = [0, 16], sizes = [8, 8], strides = [1, 1]} : vector<8x96xf32> to vector<8x8xf32>
    %41 = vector.extract_strided_slice %37 {offsets = [0, 24], sizes = [8, 8], strides = [1, 1]} : vector<8x96xf32> to vector<8x8xf32>
    %42 = vector.shape_cast %38 : vector<8x8xf32> to vector<1x8x8xf32>
    %43 = vector.shape_cast %39 : vector<8x8xf32> to vector<1x8x8xf32>
    %44 = vector.shape_cast %40 : vector<8x8xf32> to vector<1x8x8xf32>
    %45 = vector.shape_cast %41 : vector<8x8xf32> to vector<1x8x8xf32>
    %46 = tpu.concatenate %42, %43, %44, %45 in 0 : vector<1x8x8xf32>, vector<1x8x8xf32>, vector<1x8x8xf32>, vector<1x8x8xf32> -> vector<4x8x8xf32>
    %47 = arith.truncf %46 : vector<4x8x8xf32> to vector<4x8x8xbf16>
    %48 = vector.extract_strided_slice %37 {offsets = [0, 32], sizes = [8, 8], strides = [1, 1]} : vector<8x96xf32> to vector<8x8xf32>
    %49 = vector.extract_strided_slice %37 {offsets = [0, 40], sizes = [8, 8], strides = [1, 1]} : vector<8x96xf32> to vector<8x8xf32>
    %50 = vector.extract_strided_slice %37 {offsets = [0, 48], sizes = [8, 8], strides = [1, 1]} : vector<8x96xf32> to vector<8x8xf32>
    %51 = vector.extract_strided_slice %37 {offsets = [0, 56], sizes = [8, 8], strides = [1, 1]} : vector<8x96xf32> to vector<8x8xf32>
    %52 = vector.shape_cast %48 : vector<8x8xf32> to vector<1x8x8xf32>
    %53 = vector.shape_cast %49 : vector<8x8xf32> to vector<1x8x8xf32>
    %54 = vector.shape_cast %50 : vector<8x8xf32> to vector<1x8x8xf32>
    %55 = vector.shape_cast %51 : vector<8x8xf32> to vector<1x8x8xf32>
    %56 = tpu.concatenate %52, %53, %54, %55 in 0 : vector<1x8x8xf32>, vector<1x8x8xf32>, vector<1x8x8xf32>, vector<1x8x8xf32> -> vector<4x8x8xf32>
    %57 = arith.truncf %56 : vector<4x8x8xf32> to vector<4x8x8xbf16>
    %58 = vector.extract_strided_slice %37 {offsets = [0, 64], sizes = [8, 8], strides = [1, 1]} : vector<8x96xf32> to vector<8x8xf32>
    %59 = vector.extract_strided_slice %37 {offsets = [0, 72], sizes = [8, 8], strides = [1, 1]} : vector<8x96xf32> to vector<8x8xf32>
    %60 = vector.extract_strided_slice %37 {offsets = [0, 80], sizes = [8, 8], strides = [1, 1]} : vector<8x96xf32> to vector<8x8xf32>
    %61 = vector.extract_strided_slice %37 {offsets = [0, 88], sizes = [8, 8], strides = [1, 1]} : vector<8x96xf32> to vector<8x8xf32>
    %62 = vector.shape_cast %58 : vector<8x8xf32> to vector<1x8x8xf32>
    %63 = vector.shape_cast %59 : vector<8x8xf32> to vector<1x8x8xf32>
    %64 = vector.shape_cast %60 : vector<8x8xf32> to vector<1x8x8xf32>
    %65 = vector.shape_cast %61 : vector<8x8xf32> to vector<1x8x8xf32>
    %66 = tpu.concatenate %62, %63, %64, %65 in 0 : vector<1x8x8xf32>, vector<1x8x8xf32>, vector<1x8x8xf32>, vector<1x8x8xf32> -> vector<4x8x8xf32>
    %67 = arith.truncf %66 : vector<4x8x8xf32> to vector<4x8x8xbf16>
    %68 = tpu.iota {dimensions = array<i32: 0>} : vector<8x8xi32>
    %69 = tpu.iota {dimensions = array<i32: 1>} : vector<8x8xi32>
    %70 = arith.cmpi sle, %69, %68 : vector<8x8xi32>
    %cst_15 = arith.constant 0.000000e+00 : f32
    %cst_16 = arith.constant -1.000000e+30 : f32
    %71 = vector.broadcast %cst_15 : f32 to vector<8x8xf32>
    %72 = vector.broadcast %cst_16 : f32 to vector<8x8xf32>
    %73 = arith.select %70, %71, %72 : vector<8x8xi1>, vector<8x8xf32>
    "tpu.trace_start"() <{level = 10 : i32, message = "hqd,hkd->hqk"}> : () -> ()
    %cst_17 = arith.constant dense<0.000000e+00> : vector<4x8x8xf32>
    %74 = tpu.matmul %47, %57, %cst_17 {dimension_numbers = #tpu.dot_dimension_numbers<[2], [2], [1], [1], [0, 0, 0, 1, 1, 1], [0], [0]>} : vector<4x8x8xbf16>, vector<4x8x8xbf16>, vector<4x8x8xf32> -> vector<4x8x8xf32>
    "tpu.trace_stop"() : () -> ()
    %cst_18 = arith.constant 0.353553385 : f32
    %75 = vector.broadcast %cst_18 : f32 to vector<4x8x8xf32>
    %76 = arith.mulf %74, %75 : vector<4x8x8xf32>
    %77 = vector.shape_cast %73 : vector<8x8xf32> to vector<1x8x8xf32>
    %78 = vector.broadcast %77 : vector<1x8x8xf32> to vector<4x8x8xf32>
    %79 = arith.addf %76, %78 : vector<4x8x8xf32>
    %cst_19 = arith.constant dense<0xFF800000> : vector<4x8xf32>
    %80 = vector.multi_reduction <maximumf>, %79, %cst_19 [2] : vector<4x8x8xf32> to vector<4x8xf32>
    %81 = vector.shape_cast %80 : vector<4x8xf32> to vector<4x8x1xf32>
    %82 = vector.broadcast %81 : vector<4x8x1xf32> to vector<4x8x8xf32>
    %83 = arith.subf %79, %82 : vector<4x8x8xf32>
    %84 = math.exp %83 : vector<4x8x8xf32>
    %cst_20 = arith.constant dense<0.000000e+00> : vector<4x8xf32>
    %85 = vector.multi_reduction <add>, %84, %cst_20 [2] : vector<4x8x8xf32> to vector<4x8xf32>
    %86 = vector.shape_cast %85 : vector<4x8xf32> to vector<4x8x1xf32>
    %87 = tpu.reciprocal %86 {approx = true} : vector<4x8x1xf32> -> vector<4x8x1xf32>
    %88 = vector.broadcast %87 : vector<4x8x1xf32> to vector<4x8x8xf32>
    %89 = arith.mulf %84, %88 : vector<4x8x8xf32>
    %90 = arith.truncf %89 : vector<4x8x8xf32> to vector<4x8x8xbf16>
    "tpu.trace_start"() <{level = 10 : i32, message = "hqk,hkd->hqd"}> : () -> ()
    %cst_21 = arith.constant dense<0.000000e+00> : vector<4x8x8xf32>
    %91 = tpu.matmul %90, %67, %cst_21 {dimension_numbers = #tpu.dot_dimension_numbers<[2], [1], [1], [2], [0, 0, 0, 1, 1, 2], [0], [0]>} : vector<4x8x8xbf16>, vector<4x8x8xbf16>, vector<4x8x8xf32> -> vector<4x8x8xf32>
    "tpu.trace_stop"() : () -> ()
    %92 = vector.extract_strided_slice %91 {offsets = [0, 0, 0], sizes = [1, 8, 8], strides = [1, 1, 1]} : vector<4x8x8xf32> to vector<1x8x8xf32>
    %93 = vector.shape_cast %92 : vector<1x8x8xf32> to vector<8x8xf32>
    %94 = vector.extract_strided_slice %91 {offsets = [1, 0, 0], sizes = [1, 8, 8], strides = [1, 1, 1]} : vector<4x8x8xf32> to vector<1x8x8xf32>
    %95 = vector.shape_cast %94 : vector<1x8x8xf32> to vector<8x8xf32>
    %96 = vector.extract_strided_slice %91 {offsets = [2, 0, 0], sizes = [1, 8, 8], strides = [1, 1, 1]} : vector<4x8x8xf32> to vector<1x8x8xf32>
    %97 = vector.shape_cast %96 : vector<1x8x8xf32> to vector<8x8xf32>
    %98 = vector.extract_strided_slice %91 {offsets = [3, 0, 0], sizes = [1, 8, 8], strides = [1, 1, 1]} : vector<4x8x8xf32> to vector<1x8x8xf32>
    %99 = vector.shape_cast %98 : vector<1x8x8xf32> to vector<8x8xf32>
    %100 = tpu.concatenate %93, %95, %97, %99 in 1 : vector<8x8xf32>, vector<8x8xf32>, vector<8x8xf32>, vector<8x8xf32> -> vector<8x32xf32>
    %101 = arith.truncf %100 : vector<8x32xf32> to vector<8x32xbf16>
    %c0_22 = arith.constant 0 : index
    %c0_23 = arith.constant 0 : index
    %102 = vector.load %arg6[%c0_22, %c0_23] : memref<32x32xbf16, #tpu.memory_space<vmem>>, vector<32x32xbf16>
    %cst_24 = arith.constant dense<0.000000e+00> : vector<8x32xf32>
    %103 = tpu.matmul %101, %102, %cst_24 {dimension_numbers = #tpu.dot_dimension_numbers<[1], [0], [0], [1], [0, 0, 1, 1], [], []>} : vector<8x32xbf16>, vector<32x32xbf16>, vector<8x32xf32> -> vector<8x32xf32>
    %c0_25 = arith.constant 0 : index
    %c0_26 = arith.constant 0 : index
    %104 = vector.load %arg7[%c0_25, %c0_26] : memref<1x32xf32, #tpu.memory_space<vmem>>, vector<1x32xf32>
    %105 = vector.shape_cast %104 : vector<1x32xf32> to vector<32xf32>
    %106 = vector.shape_cast %105 : vector<32xf32> to vector<1x32xf32>
    %107 = vector.broadcast %106 : vector<1x32xf32> to vector<8x32xf32>
    %108 = arith.addf %103, %107 : vector<8x32xf32>
    %109 = arith.addf %1, %108 : vector<8x32xf32>
    %c0_27 = arith.constant 0 : index
    %c0_28 = arith.constant 0 : index
    %c0_29 = arith.constant 0 : index
    %110 = vector.load %arg8[%c0_27, %c0_28, %c0_29] : memref<1x8x32xf32, #tpu.memory_space<vmem>>, vector<1x8x32xf32>
    %111 = vector.shape_cast %110 : vector<1x8x32xf32> to vector<8x32xf32>
    %112 = vector.shape_cast %109 : vector<8x32xf32> to vector<1x8x32xf32>
    tpu.vector_store %arg8[%c0_27, %c0_28, %c0_29], %112 {strides = array<i32>} : memref<1x8x32xf32, #tpu.memory_space<vmem>>, vector<1x8x32xf32>,
    return
  }
  func.func @transform_0(%arg0: i32) -> (i32, i32, i32) {
    %c0_i32 = arith.constant 0 : i32
    %c0_i32_0 = arith.constant 0 : i32
    %c0_i32_1 = arith.constant 0 : i32
    return %arg0, %c0_i32, %c0_i32_0 : i32, i32, i32
  }
  func.func @transform_1(%arg0: i32) -> (i32, i32) {
    %c0_i32 = arith.constant 0 : i32
    %c0_i32_0 = arith.constant 0 : i32
    %c0_i32_1 = arith.constant 0 : i32
    return %c0_i32, %c0_i32_0 : i32, i32
  }
  func.func @transform_2(%arg0: i32) -> (i32, i32) {
    %c0_i32 = arith.constant 0 : i32
    %c0_i32_0 = arith.constant 0 : i32
    %c0_i32_1 = arith.constant 0 : i32
    return %c0_i32, %c0_i32_0 : i32, i32
  }
  func.func @transform_3(%arg0: i32) -> (i32, i32) {
    %c0_i32 = arith.constant 0 : i32
    %c0_i32_0 = arith.constant 0 : i32
    %c0_i32_1 = arith.constant 0 : i32
    return %c0_i32, %c0_i32_0 : i32, i32
  }
  func.func @transform_4(%arg0: i32) -> (i32, i32) {
    %c0_i32 = arith.constant 0 : i32
    %c0_i32_0 = arith.constant 0 : i32
    %c0_i32_1 = arith.constant 0 : i32
    return %c0_i32, %c0_i32_0 : i32, i32
  }
  func.func @transform_5(%arg0: i32) -> (i32, i32) {
    %c0_i32 = arith.constant 0 : i32
    %c0_i32_0 = arith.constant 0 : i32
    %c0_i32_1 = arith.constant 0 : i32
    return %c0_i32, %c0_i32_0 : i32, i32
  }
  func.func @transform_6(%arg0: i32) -> (i32, i32) {
    %c0_i32 = arith.constant 0 : i32
    %c0_i32_0 = arith.constant 0 : i32
    %c0_i32_1 = arith.constant 0 : i32
    return %c0_i32, %c0_i32_0 : i32, i32
  }
  func.func @transform_7(%arg0: i32) -> (i32, i32, i32) {
    %c0_i32 = arith.constant 0 : i32
    %c0_i32_0 = arith.constant 0 : i32
    %c0_i32_1 = arith.constant 0 : i32
    return %arg0, %c0_i32, %c0_i32_0 : i32, i32, i32
  }
}

</mosaic_0001>

<bundles_post_ra>
// kernel: tpu_custom_call.1
= control target key start
LH: loop header
LB: loop body
LE: loop exit
PB: predicated region body
PF: predicated region fallthrough
CT: control target
= control target key end

     0   :  { %12 = vsyncpa [#allocation3], 0  ;;  %s1853_s0 = inlined_call_operand.hbm [shape: f32[2,8,32], index: 0, kind: input, shape index: {}]   ;;  %s1854_s1 = inlined_call_operand.vmem [shape: f32[1,32], index: 1, kind: input, shape index: {}]   ;;  %s1855_s2 = inlined_call_operand.vmem [shape: f32[1,32], index: 2, kind: input, shape index: {}]   ;;  %s1856_s3 = inlined_call_operand.hbm [shape: bf16[32,96], index: 3, kind: input, shape index: {}]   ;;  %s1857_s4 = inlined_call_operand.hbm [shape: f32[1,96], index: 4, kind: input, shape index: {}]   ;;  %s1858_s5 = inlined_call_operand.vmem [shape: bf16[32,32], index: 5, kind: input, shape index: {}]   ;;  %s1859_s6 = inlined_call_operand.vmem [shape: f32[1,32], index: 6, kind: input, shape index: {}]   ;;  %s1860_s7 = inlined_call_operand.hbm [shape: f32[2,8,32], index: 7, kind: output, shape index: {}]  }
   0x1   :  { %14 = vsyncpa [#allocation3 + $0x1], 0 }
   0x2   :  { %15 = vsyncpa [#allocation6], 0 }
   0x3   :  { %16 = vsyncpa [#allocation4], 0 }
   0x4   :  { %18 = vsyncpa [#allocation4 + $0x1], 0  ;;  %s1513_s24 = smov 0   ;;  %s1515_s25 = smov 0  }
   0x5   :  { %s1517_s26 = smov 0   ;;  %s1519_s27 = smov 0  }
   0x6 LB: > { %s1534_s28 = sadd.s32 4294967295, %s1454_s27   ;;  %s1076_s29 = sadd.s32 4294967294, %s1454_s27   ;;  %s1454_s27 = sphi %s1519_s27, %s1880_s27   ;;  %s1450_s26 = sphi %s1517_s26, %s1879_s26   ;;  %s1446_s25 = sphi %s1515_s25, %s1878_s25   ;;  %s1442_s24 = sphi %s1513_s24, %s1877_s24  }
   0x7   : > { %p44_p0 = scmp.ne.s32.totalorder %s1446_s25, %s1442_s24  ;;  %p1861_p1 = scmp.eq.s32.totalorder %s1534_s28, 0 }
   0x8   : > { %p200_p3 = scmp.eq.s32.totalorder %s1076_s29, 1  ;;  %p1077_p5 = scmp.ge.s32.totalorder %s1454_s27, 1 }
   0x9   : > { %p1543_p4 = por %p1861_p1, %p44_p0  ;;  %p207_p7 = scmp.lt.s32.totalorder %s1454_s27, 3 }
   0xa   : > { %p1548_p6 = por %p200_p3, %p44_p0  ;;  %s1456_s10 = smov [#allocation5]  }
   0xb   : > { %s1864_s30 = scalar_select %p1543_p4, 1, 0 }
   0xc   : > { %s1865_s8 = scalar_select %p1548_p6, 1, 0 }
   0xd   : > { %p1553_p8 = pnand %p1077_p5, %p207_p7  ;;  %s225_s11 = sshll.u32 %s1456_s10, 4  ;;  %s1557_s11 = int_to_ptr.vmem [resolvable:$true] %s225_s11 }
   0xe   : > { %s1457_s13 = smov [#allocation7]   ;;  %s1298_s17 = scalar_lea.hbm %s1856_s3, 256 }
   0xf   : > { %p1208_p9 = pneg %p1553_p8  ;;  %s239_s14 = sshll.u32 %s1457_s13, 4  ;;  %s1568_s14 = int_to_ptr.vmem [resolvable:$true] %s239_s14 }
  0x10   : > { %p1299_p12 = scmp.ne.s32.totalorder %s1856_s3, %s1298_s17  ;;  %p1305_p5 = scmp.lt.u32.totalorder %s1298_s17, %s1856_s3 }
  0x11   : > { %p1564_p11 = pnand %p1208_p9, %p1861_p1 }
  0x13   : > { %p1300_p13 = pneg %p1564_p11 }
  0x15   : > { %p1301_p0 = pnand %p1300_p13, %p1299_p12 }
  0x17   : > { %p1302_p3 = pneg %p1301_p0 }
  0x19   : > { %p1307_p7 = pnand %p1305_p5, %p1302_p3 }
  0x1b   : > { %1310 = shalt.err (!%p1307_p7)
}
  0x1c   : > { %s1311_s22 = scalar_lea.vmem %s1557_s11, 256  ;;  %p1319_p2 = scmp.lt.s32.totalorder %s1557_s11, %s1557_s11 }
  0x1d   : > { %p1312_p9 = scmp.ne.s32.totalorder %s1557_s11, %s1311_s22  ;;  %p1320_p12 = scmp.lt.s32.totalorder %s1311_s22, %s1311_s22 }
  0x1f   : > { %p1314_p10 = pnand %p1312_p9, %p1300_p13  ;;  %p1321_p0 = por %p1320_p12, %p1319_p2 }
  0x21   : > { %p1315_p1 = pneg %p1314_p10 }
  0x23   : > { %p1322_p6 = pnand %p1321_p0, %p1315_p1 }
  0x25   : > { %1325 = shalt.err (!%p1322_p6)
}
  0x26   : > { %s1458_s23 = smov 64   ;;  %s1459_s29 = smov 4  }
  0x27   : > { %1211 = dma.hbm_to_vmem [thread:$0]  (!%p1564_p11), %s1856_s3, 256, %s1557_s11, [#allocation6], %s1458_s23, %s1458_s23, %s1459_s29  }
  0x28   : > { %s1326_s17 = scalar_lea.hbm %s1857_s4, 16 }
  0x29   : > { %p1327_p2 = scmp.ne.s32.totalorder %s1857_s4, %s1326_s17  ;;  %p1333_p10 = scmp.lt.u32.totalorder %s1326_s17, %s1857_s4 }
  0x2b   : > { %p1329_p1 = pnand %p1327_p2, %p1300_p13 }
  0x2d   : > { %p1330_p6 = pneg %p1329_p1 }
  0x2f   : > { %p1335_p3 = pnand %p1333_p10, %p1330_p6 }
  0x31   : > { %1338 = shalt.err (!%p1335_p3)
}
  0x32   : > { %s1339_s11 = scalar_lea.vmem %s1568_s14, 16  ;;  %s1346_s22 = scalar_lea.vmem %s1568_s14, 32 }
  0x33   : > { %p1340_p5 = scmp.ne.s32.totalorder %s1568_s14, %s1339_s11  ;;  %p1347_p12 = scmp.lt.s32.totalorder %s1568_s14, %s1568_s14 }
  0x34   : > { %p1348_p0 = scmp.lt.s32.totalorder %s1346_s22, %s1339_s11 }
  0x35   : > { %p1342_p7 = pnand %p1340_p5, %p1300_p13 }
  0x36   : > { %p1349_p2 = por %p1348_p0, %p1347_p12 }
  0x37   : > { %p1343_p9 = pneg %p1342_p7 }
  0x39   : > { %p1350_p1 = pnand %p1349_p2, %p1343_p9 }
  0x3b   : > { %1353 = shalt.err (!%p1350_p1)
}
  0x3c   : > { %1214 = dma.hbm_to_vmem [thread:$0]  (!%p1564_p11), %s1857_s4, 16, %s1568_s14, [#allocation6]  }
  0x3d   : > { %s1624_s10 = sadd.s32 1, %s1454_s27   ;;  %s31_s12 = sadd.s32 1, %s1450_s26 }
  0x3e   : > { %s28_s13 = ssub.s32 %s1454_s27, %s1624_s10  ;;  %p38_p13 = scmp.ne.s32.totalorder %s1450_s26, %s1446_s25 }
  0x3f   : > { %p29_p6 = scmp.eq.s32.totalorder %s28_s13, 0  ;;  %p39_p10 = scmp.eq.s32.totalorder %s1454_s27, 0 }
  0x40   : > { %p1868_p3 = scmp.eq.s32.totalorder %s1534_s28, 1  ;;  %p1225_p7 = scmp.lt.s32.totalorder %s1454_s27, 2 }
  0x41   : > { %s1640_s16 = scalar_select %p29_p6, %s1450_s26, %s31_s12  }
  0x42   : > { %p1634_p5 = por %p1868_p3, %p38_p13  ;;  %p40_p9 = por %p39_p10, %p38_p13 }
  0x43   : > { %s256_s17 = sand.u32 1, %s1450_s26   ;;  %s1082_s14 = sshll.u32 %s1454_s27, 7 }
  0x44   : > { %s1869_s15 = scalar_select %p1634_p5, 1, 0 }
  0x45   : > { %s1081_s18 = sshll.u32 %s256_s17, 3  ;;  %s1647_s21 = scalar_lea.hbm %s1853_s0, %s1082_s14 }
  0x46   : > { %s260_s11 = scalar_lea.vmem [#allocation2], %s1081_s18  ;;  %p1651_p11 = pnand %p1225_p7, %p40_p9 }
  0x47   : > { %s267_s22 = sshll.u32 %s260_s11, 4  ;;  %s257_s29 = scalar_lea.sflag [#allocation3], %s256_s17  ;;  %s1649_s22 = int_to_ptr.vmem [resolvable:$true] %s267_s22 }
  0x48   : > { %s1354_s12 = scalar_lea.hbm %s1647_s21, 128  ;;  %p1356_p0 = pneg %p1651_p11 }
  0x49   : > { %p1355_p12 = scmp.ne.s32.totalorder %s1647_s21, %s1354_s12  ;;  %s1359_s14 = scalar_lea.hbm %s1853_s0, 256 }
  0x4a   : > { %p1360_p13 = scmp.lt.u32.totalorder %s1647_s21, %s1853_s0  ;;  %p1361_p6 = scmp.lt.u32.totalorder %s1359_s14, %s1354_s12 }
  0x4b   : > { %p1357_p2 = pnand %p1356_p0, %p1355_p12  ;;  %p1363_p3 = scmp.lt.u32.totalorder %s1354_s12, %s1647_s21 }
  0x4c   : > { %p1362_p10 = por %p1361_p6, %p1360_p13 }
  0x4d   : > { %p1358_p1 = pneg %p1357_p2 }
  0x4e   : > { %p1364_p7 = por %p1363_p3, %p1362_p10 }
  0x50   : > { %p1365_p9 = pnand %p1364_p7, %p1358_p1 }
  0x52   : > { %1368 = shalt.err (!%p1365_p9)
}
  0x53   : > { %s1369_s17 = scalar_lea.vmem %s1649_s22, 128  ;;  %s1460_s11 = smov [#allocation2]  }
  0x54   : > { %p1370_p12 = scmp.ne.s32.totalorder %s1649_s22, %s1369_s17  ;;  %s1374_s13 = sshll.u32 %s1460_s11, 4  ;;  %s1375_s13 = int_to_ptr.vmem [resolvable:$false] %s1374_s13 }
  0x55   : > { %s1376_s18 = scalar_lea.vmem %s1375_s13, 256  ;;  %p1377_p4 = scmp.lt.s32.totalorder %s1649_s22, %s1375_s13 }
  0x56   : > { %p1372_p2 = pnand %p1370_p12, %p1356_p0  ;;  %p1378_p13 = scmp.lt.s32.totalorder %s1376_s18, %s1369_s17 }
  0x58   : > { %p1373_p5 = pneg %p1372_p2  ;;  %p1379_p6 = por %p1378_p13, %p1377_p4 }
  0x5a   : > { %p1380_p10 = pnand %p1379_p6, %p1373_p5 }
  0x5c   : > { %1383 = shalt.err (!%p1380_p10)
}
  0x5d   : > { %1218 = dma.hbm_to_vmem [thread:$0]  (!%p1651_p11), %s1647_s21, 128, %s1649_s22, %s257_s29  }
  0x5e   : > { %276 = sbr.rel (%p1553_p8) target bundleno = 1976 (0x7b8), region = 48  ;;  %s1683_s12 = sand.u32 (!%p1553_p8), 1, %s1446_s25  }
  0x5f   : > { %s1084_s14 = sshll.u32 (!%p1553_p8), %s1683_s12, 3  ;;  %s279_s19 = scalar_lea.sflag (!%p1553_p8), [#allocation3], %s1683_s12 }
  0x60   : > { %s282_s20 = scalar_lea.vmem (!%p1553_p8), [#allocation2], %s1084_s14  ;;  %p1871_p4 = scmp.ne.s32.totalorder (!%p1553_p8), %s1864_s30, 0 }
  0x65   : > { %1429 = dma.done.wait (%p1871_p4), %s279_s19, 128  }
  0x66   : > { %1431 = vsyncadd (%p1871_p4), %s279_s19, 4294967168  ;;  %p1872_p5 = scmp.eq.s32.totalorder %s1534_s28, 0 }
  0x68   : > { %1433 = dma.done.wait (%p1872_p5), [#allocation6], 272   ;;  %p1873_p8 = pmov %p1872_p5 }
  0x69   : > { %vm325_vm0 = vcmask 261120   ;;  %v1697_v0 = vld [vmem:[%s282_s20] sm:$0xff]  ;;  %v1276_v7 = vld [vmem:[#allocation5] sm:$0xff]   ;;  %v1461_v8 = vmov 0.0   ;;  %vm1462_vm1 = vmmov 0   ;;  %v1277_v9 = vld [vmem:[#allocation5 + $0x8] sm:$0xff]   ;;  %v435_v41 = vlaneseq }
  0x6a   : > { %1435 = vsyncadd (%p1873_p8), [#allocation6], 4294967024  ;;  %v326_v1 = vsel %vm325_vm0, %v1697_v0, 0.0  ;;  %1132 = vmatprep.subr.bf16.mxu0 %v1461_v8  ;;  %1136 = vmatprep.mubr.msk.bf16.mxu0 %vm1462_vm1, %v1461_v8  ;;  %v1088_v14 = vld [vmem:[%s1854_s1] ss:$0 sm:$0xff]  ;;  %s1463_s23 = smov 104  }
  0x6b   : > { %327 = vadd.xlane.f32.xlu0 %v326_v1  ;;  %1133 = vmatpush3.bf16.msra.mxu0 %v1276_v7  ;;  %v1089_v16 = vld [vmem:[%s1855_s2] ss:$0 sm:$0xff]  ;;  %s1464_s29 = smov 120   ;;  %s1465_s17 = smov 112   ;;  %vm444_vm2 = vcmask 64512   ;;  %v436_v42 = vshrl.u32 %v435_v41, 7 }
  0x6c   : > { %1140 = vmatprep.subr.bf16.mxu1 %v1461_v8  ;;  %1134 = vmatprep.subr.bf16.mxu0 %v1461_v8  ;;  %v1090_v20 = vld [vmem:[#allocation7] ss:$0 sm:$0xff]  ;;  %s1466_s11 = smov 96   ;;  %v438_v43 = vand.u32 127, %v435_v41  ;;  %v1467_v45 = vmov -1e+30  }
  0x6d   : > { %1142 = vmatprep.mubr.msk.bf16.mxu1 %vm1462_vm1, %v1461_v8  ;;  %s1468_s13 = smov 64   ;;  %vm699_vm4 = vcmask 1043456   ;;  %s1469_s9 = smov 8   ;;  %vm900_vm5 = vcmask 130048   ;;  %vm902_vm6 = vcmask 195584  }
  0x6e   : > { %vm439_vm3 = vcmp.le.s32.totalorder %v438_v43, %v436_v42  ;;  %s1470_s21 = smov 16   ;;  %s1471_s22 = smov 24  }
  0x6f   : > { %1135 = vmatpush3.bf16.msra.mxu0 %v1277_v9  ;;  %v440_v46 = vsel %vm439_vm3, 0.0, %v1467_v45  ;;  %p1874_p0 = scmp.ne.s32.totalorder %s1869_s15, 0  ;;  %s1472_s30 = smov [#allocation8]  }
  0x70   : > { %1146 = vmatprep.subr.bf16.mxu0 %v1461_v8 }
  0xf8   : > { %v328_v2 = vpop.xlane.xlu0 %327 }
  0xf9   : > { %v330_v3 = vmul.f32 0.03125, %v328_v2 }
  0xfb   : > { %v331_v4 = vsub.f32 %v1697_v0, %v330_v3 }
  0xfd   : > { %v332_v5 = vmul.f32 %v331_v4, %v331_v4 }
  0xff   : > { %v333_v6 = vsel %vm325_vm0, %v332_v5, 0.0 }
 0x100   : > { %334 = vadd.xlane.f32.xlu0 %v333_v6 }
 0x18d   : > { %v335_v10 = vpop.xlane.xlu0 %334 }
 0x18e   : > { %v336_v11 = vmul.f32 0.03125, %v335_v10 }
 0x190   : > { %v337_v12 = vadd.f32 1e-05, %v336_v11 }
 0x192   : > { %1280 = vrsqrt.f32 %v337_v12 }
 0x19c   : > { %v1281_v13 = vpop.eup %1280 }
 0x19d   : > { %v339_v15 = vmul.f32 %v1281_v13, %v331_v4 }
 0x19f   : > { %v346_v17 = vmul.f32 %v1088_v14, %v339_v15 }
 0x1a1   : > { %v353_v18 = vadd.f32 %v1089_v16, %v346_v17 }
 0x1a3   : > { %v354_v19 = vpack.c.bf16 %v353_v18, %v353_v18 }
 0x1a5   : > { %1137 = vmatmul.mubr.msk.bf16.vlgmr.msra.gmra.mrb[0].mxu0 %vm325_vm0, %v354_v19 }
 0x1a6   : > { %1148 = vmatprep.mubr.msk.bf16.mxu0 %vm1462_vm1, %v1461_v8 }
 0x278   : > { %v415_v21 = vpop.f32.mrb[0].mxu0 }
 0x279   : > { %v416_v22 = vadd.f32 %v1090_v20, %v415_v21  ;;  %v1138_v23 = vpop.f32.mrb[1].mxu0 }
 0x27a   : > { %v418_v24 = vpop.f32.mrb[2].mxu0 }
 0x27b   : > { %428 = vrot.lane.b32.xlu0 %v416_v22, %s1463_s23  ;;  %422 = vrot.lane.b32.xlu1 %v416_v22, %s1464_s29  ;;  %v1139_v25 = vpop.f32.mrb[3].mxu0  ;;  %v1720_v26 = vpack.c.bf16 %v416_v22, %v416_v22 }
 0x27f   : > { %425 = vrot.lane.b32.xlu1 %v416_v22, %s1465_s17  ;;  %s1107_s17 = sshll.u32 %s1534_s28, 7  ;;  %s974_s28 = scalar_lea.sflag [#allocation4], %s1683_s12 }
 0x280   : > { %s1808_s20 = scalar_lea.hbm %s1860_s7, %s1107_s17 }
 0x283   : > { %442 = vrot.lane.b32.xlu1 %v1720_v26, %s1466_s11 }
 0x2ed   : > { %v423_v27 = vpop.permute.xlu1 %422  ;;  %v429_v31 = vpop.permute.xlu0 %428 }
 0x2ee   : > { %v1723_v28 = vpack.c.bf16 %v423_v27, %v423_v27  ;;  %v1729_v33 = vpack.c.bf16 %v429_v31, %v429_v31 }
 0x2f0   : > { %492 = vrot.lane.b32.xlu1 %v1723_v28, %s1466_s11 }
 0x2f1   : > { %v426_v29 = vpop.permute.xlu1 %425 }
 0x2f2   : > { %v1726_v30 = vpack.c.bf16 %v426_v29, %v426_v29 }
 0x2f4   : > { %541 = vrot.lane.b32.xlu1 %v1726_v30, %s1466_s11 }
 0x2f5   : > { %v443_v32 = vpop.permute.xlu1 %442 }
 0x2f6   : > { %v449_v34 = vsel %vm444_vm2, %v443_v32, 0 }
 0x2f7   : > { %1141 = vmatpush3.bf16.xpose.msra.mxu1 %v449_v34 }
 0x2f8   : > { %590 = vrot.lane.b32.xlu1 %v1729_v33, %s1466_s11  ;;  %1152 = vmatprep.subr.bf16.mxu1 %v1461_v8  ;;  %s320_s11 = scalar_lea.vmem [#allocation8], %s1084_s14 }
 0x2fe   : > { %1143 = vmatmul.mubr.msk.bf16.vlgmr.msra.gmra.mrb[0].mxu1 %vm444_vm2, %v1720_v26 }
 0x2ff   : > { %1154 = vmatprep.mubr.msk.bf16.mxu1 %vm1462_vm1, %v1461_v8 }
 0x362   : > { %v493_v35 = vpop.permute.xlu1 %492 }
 0x363   : > { %v498_v36 = vsel %vm444_vm2, %v493_v35, 0 }
 0x364   : > { %1147 = vmatpush3.bf16.xpose.msra.mxu0 %v498_v36 }
 0x365   : > { %1158 = vmatprep.subr.bf16.mxu0 %v1461_v8 }
 0x366   : > { %v542_v37 = vpop.permute.xlu1 %541 }
 0x367   : > { %v547_v38 = vsel %vm444_vm2, %v542_v37, 0 }
 0x368   : > { %1153 = vmatpush3.bf16.xpose.msra.mxu1 %v547_v38 }
 0x369   : > { %1164 = vmatprep.subr.bf16.mxu1 %v1461_v8 }
 0x36a   : > { %v591_v39 = vpop.permute.xlu1 %590 }
 0x36b   : > { %v596_v40 = vsel %vm444_vm2, %v591_v39, 0  ;;  %1149 = vmatmul.mubr.msk.bf16.vlgmr.msra.gmra.mrb[4].mxu0 %vm444_vm2, %v1723_v28 }
 0x36c   : > { %1159 = vmatpush3.bf16.xpose.msra.mxu0 %v596_v40  ;;  %1160 = vmatprep.mubr.msk.bf16.mxu0 %vm1462_vm1, %v1461_v8 }
 0x36d   : > { %1170 = vmatprep.subr.bf16.mxu0 %v1461_v8 }
 0x36f   : > { %1155 = vmatmul.mubr.msk.bf16.vlgmr.msra.gmra.mrb[4].mxu1 %vm444_vm2, %v1726_v30 }
 0x370   : > { %1166 = vmatprep.mubr.msk.bf16.mxu1 %vm1462_vm1, %v1461_v8 }
 0x373   : > { %1161 = vmatmul.mubr.msk.bf16.vlgmr.msra.gmra.mrb[8].mxu0 %vm444_vm2, %v1729_v33 }
 0x374   : > { %1172 = vmatprep.mubr.msk.bf16.mxu0 %vm1462_vm1, %v1461_v8 }
 0x3d1   : > { %v485_v44 = vpop.f32.mrb[0].mxu1 }
 0x3d2   : > { %v638_v47 = vmul.f32 0.35355338, %v485_v44  ;;  %v1144_v48 = vpop.f32.mrb[1].mxu1 }
 0x3d3   : > { %v488_v49 = vpop.f32.mrb[2].mxu1 }
 0x3d4   : > { %v1145_v50 = vpop.f32.mrb[3].mxu1  ;;  %v642_v51 = vadd.f32 %v638_v47, %v440_v46 }
 0x3d6   : > { %v646_v52 = vsel %vm444_vm2, %v642_v51, -inf }
 0x3d7   : > { %647 = vmax.xlane.f32.xlu1 %v646_v52 }
 0x43e   : > { %v534_v53 = vpop.f32.mrb[4].mxu0 }
 0x43f   : > { %v639_v54 = vmul.f32 0.35355338, %v534_v53  ;;  %v1150_v55 = vpop.f32.mrb[5].mxu0 }
 0x440   : > { %v537_v56 = vpop.f32.mrb[6].mxu0 }
 0x441   : > { %v1151_v57 = vpop.f32.mrb[7].mxu0  ;;  %v643_v58 = vadd.f32 %v639_v54, %v440_v46 }
 0x442   : > { %v583_v59 = vpop.f32.mrb[4].mxu1 }
 0x443   : > { %v640_v60 = vmul.f32 0.35355338, %v583_v59  ;;  %v1156_v61 = vpop.f32.mrb[5].mxu1  ;;  %v649_v62 = vsel %vm444_vm2, %v643_v58, -inf }
 0x444   : > { %v586_v63 = vpop.f32.mrb[6].mxu1  ;;  %650 = vmax.xlane.f32.xlu0 %v649_v62  ;;  %v1279_v61 = vld [vmem:[%s1858_s5 + $0x8] sm:$0xff]  }
 0x445   : > { %v1157_v1 = vpop.f32.mrb[7].mxu1  ;;  %v644_v2 = vadd.f32 %v640_v60, %v440_v46  ;;  %v1278_v60 = vld [vmem:[%s1858_s5] sm:$0xff]  }
 0x446   : > { %v632_v3 = vpop.f32.mrb[8].mxu0 }
 0x447   : > { %v641_v4 = vmul.f32 0.35355338, %v632_v3  ;;  %v1162_v5 = vpop.f32.mrb[9].mxu0  ;;  %v652_v6 = vsel %vm444_vm2, %v644_v2, -inf }
 0x448   : > { %653 = vmax.xlane.f32.xlu1 %v652_v6  ;;  %v635_v7 = vpop.f32.mrb[10].mxu0 }
 0x449   : > { %v1163_v9 = vpop.f32.mrb[11].mxu0  ;;  %v645_v10 = vadd.f32 %v641_v4, %v440_v46 }
 0x44b   : > { %v655_v11 = vsel %vm444_vm2, %v645_v10, -inf }
 0x44c   : > { %656 = vmax.xlane.f32.xlu0 %v655_v11 }
 0x459   : > { %694 = vrot.lane.b32.xlu1 %v1720_v26, %s1468_s13 }
 0x464   : > { %v648_v12 = vpop.xlane.xlu1 %647 }
 0x465   : > { %v658_v13 = vsub.f32 %v642_v51, %v648_v12 }
 0x467   : > { %v662_v14 = vmul.f32 1.442695, %v658_v13 }
 0x469   : > { %1282 = vpow2.f32 %v662_v14 }
 0x473   : > { %v1283_v15 = vpop.eup %1282 }
 0x474   : > { %v670_v16 = vsel %vm444_vm2, %v1283_v15, 0.0 }
 0x47d   : > { %671 = vadd.xlane.f32.xlu1 %v670_v16 }
 0x4d1   : > { %v651_v17 = vpop.xlane.xlu0 %650 }
 0x4d2   : > { %v659_v18 = vsub.f32 %v643_v58, %v651_v17 }
 0x4d4   : > { %v664_v19 = vmul.f32 1.442695, %v659_v18  ;;  %v1102_v18 = vld [vmem:[%s1859_s6] ss:$0 sm:$0xff] }
 0x4d5   : > { %v654_v20 = vpop.xlane.xlu1 %653 }
 0x4d6   : > { %1284 = vpow2.f32 %v664_v19  ;;  %v660_v21 = vsub.f32 %v644_v2, %v654_v20 }
 0x4d8   : > { %v666_v22 = vmul.f32 1.442695, %v660_v21 }
 0x4d9   : > { %v695_v23 = vpop.permute.xlu1 %694  ;;  %v657_v24 = vpop.xlane.xlu0 %656 }
 0x4da   : > { %1286 = vpow2.f32 %v666_v22  ;;  %v701_v25 = vsel %vm699_vm4, %v695_v23, 0  ;;  %v661_v26 = vsub.f32 %v645_v10, %v657_v24 }
 0x4db   : > { %1165 = vmatpush3.bf16.msra.mxu1 %v701_v25 }
 0x4dc   : > { %v668_v27 = vmul.f32 1.442695, %v661_v26  ;;  %1176 = vmatprep.subr.bf16.mxu1 %v1461_v8 }
 0x4de   : > { %1288 = vpow2.f32 %v668_v27 }
 0x4e0   : > { %v1285_v29 = vpop.eup %1284 }
 0x4e1   : > { %v673_v31 = vsel %vm444_vm2, %v1285_v29, 0.0 }
 0x4e2   : > { %674 = vadd.xlane.f32.xlu0 %v673_v31 }
 0x4e4   : > { %v1287_v32 = vpop.eup %1286 }
 0x4e5   : > { %v676_v34 = vsel %vm444_vm2, %v1287_v32, 0.0 }
 0x4e6   : > { %677 = vadd.xlane.f32.xlu1 %v676_v34 }
 0x4e8   : > { %v1289_v35 = vpop.eup %1288 }
 0x4e9   : > { %v679_v36 = vsel %vm444_vm2, %v1289_v35, 0.0 }
 0x4ea   : > { %680 = vadd.xlane.f32.xlu0 %v679_v36 }
 0x4f7   : > { %791 = vrot.lane.b32.xlu1 %v1726_v30, %s1468_s13 }
 0x4fb   : > { %839 = vrot.lane.b32.xlu1 %v1729_v33, %s1468_s13 }
 0x500   : > { %743 = vrot.lane.b32.xlu0 %v1723_v28, %s1468_s13  ;;  %s987_s13 = sshll.u32 %s320_s11, 4  ;;  %s1810_s13 = int_to_ptr.vmem [resolvable:$true] %s987_s13 }
 0x501   : > { %s1384_s14 = scalar_lea.vmem %s1810_s13, 128 }
 0x502   : > { %p1385_p11 = scmp.ne.s32.totalorder %s1810_s13, %s1384_s14 }
 0x504   : > { %p1386_p1 = pnand %p1385_p11, %p1874_p0 }
 0x506   : > { %p1387_p3 = pneg %p1386_p1 }
 0x50a   : > { %v672_v37 = vpop.xlane.xlu1 %671 }
 0x50b   : > { %1290 = vrcp.f32 %v672_v37 }
 0x515   : > { %v1291_v38 = vpop.eup %1290 }
 0x516   : > { %v686_v39 = vmul.f32 %v1291_v38, %v1283_v15 }
 0x518   : > { %v690_v40 = vpack.c.bf16 %v686_v39, %v686_v39 }
 0x51a   : > { %1167 = vmatmul.mubr.msk.bf16.vlgmr.msra.gmra.mrb[8].mxu1 %vm444_vm2, %v690_v40 }
 0x51b   : > { %1178 = vmatprep.mubr.msk.bf16.mxu1 %vm1462_vm1, %v1461_v8 }
 0x56f   : > { %v675_v41 = vpop.xlane.xlu0 %674 }
 0x570   : > { %1292 = vrcp.f32 %v675_v41 }
 0x573   : > { %v678_v42 = vpop.xlane.xlu1 %677 }
 0x574   : > { %1294 = vrcp.f32 %v678_v42 }
 0x577   : > { %v792_v30 = vpop.permute.xlu1 %791  ;;  %v681_v43 = vpop.xlane.xlu0 %680 }
 0x578   : > { %v797_v33 = vsel %vm699_vm4, %v792_v30, 0  ;;  %1296 = vrcp.f32 %v681_v43 }
 0x579   : > { %1177 = vmatpush3.bf16.msra.mxu1 %v797_v33 }
 0x57a   : > { %v1293_v28 = vpop.eup %1292  ;;  %1188 = vmatprep.subr.bf16.mxu1 %v1461_v8 }
 0x57b   : > { %v687_v44 = vmul.f32 %v1293_v28, %v1285_v29  ;;  %v744_v45 = vpop.permute.xlu0 %743  ;;  %v840_v47 = vpop.permute.xlu1 %839 }
 0x57c   : > { %v749_v46 = vsel %vm699_vm4, %v744_v45, 0  ;;  %v845_v51 = vsel %vm699_vm4, %v840_v47, 0 }
 0x57d   : > { %1171 = vmatpush3.bf16.msra.mxu0 %v749_v46  ;;  %v691_v48 = vpack.c.bf16 %v687_v44, %v687_v44 }
 0x57e   : > { %v1295_v49 = vpop.eup %1294  ;;  %1182 = vmatprep.subr.bf16.mxu0 %v1461_v8 }
 0x57f   : > { %v688_v50 = vmul.f32 %v1295_v49, %v1287_v32 }
 0x580   : > { %1173 = vmatmul.mubr.msk.bf16.vlgmr.msra.gmra.mrb[12].mxu0 %vm444_vm2, %v691_v48 }
 0x581   : > { %1183 = vmatpush3.bf16.msra.mxu0 %v845_v51  ;;  %v692_v52 = vpack.c.bf16 %v688_v50, %v688_v50  ;;  %1184 = vmatprep.mubr.msk.bf16.mxu0 %vm1462_vm1, %v1461_v8 }
 0x582   : > { %v1297_v53 = vpop.eup %1296 }
 0x583   : > { %v689_v54 = vmul.f32 %v1297_v53, %v1289_v35  ;;  %1179 = vmatmul.mubr.msk.bf16.vlgmr.msra.gmra.mrb[12].mxu1 %vm444_vm2, %v692_v52 }
 0x584   : > { %1192 = vmatprep.mubr.msk.bf16.mxu1 %vm1462_vm1, %v1461_v8  ;;  %1189 = vmatpush3.bf16.msra.mxu1 %v1278_v60 }
 0x585   : > { %v693_v55 = vpack.c.bf16 %v689_v54, %v689_v54  ;;  %1190 = vmatprep.subr.bf16.mxu1 %v1461_v8 }
 0x588   : > { %1185 = vmatmul.mubr.msk.bf16.vlgmr.msra.gmra.mrb[16].mxu0 %vm444_vm2, %v693_v55  ;;  %1191 = vmatpush3.bf16.msra.mxu1 %v1279_v61 }
 0x5ed   : > { %v737_v56 = vpop.f32.mrb[8].mxu1 }
 0x5ee   : > { %v1168_v57 = vpop.f32.mrb[9].mxu1 }
 0x5ef   : > { %v740_v58 = vpop.f32.mrb[10].mxu1 }
 0x5f0   : > { %v1169_v59 = vpop.f32.mrb[11].mxu1 }
 0x653   : > { %v785_v62 = vpop.f32.mrb[12].mxu0 }
 0x654   : > { %888 = vrot.lane.b32.xlu0 %v785_v62, %s1469_s9  ;;  %v1174_v63 = vpop.f32.mrb[13].mxu0  ;;  %s1388_s9 = sshll.u32 %s1472_s30, 4  ;;  %s1389_s9 = int_to_ptr.vmem [resolvable:$false] %s1388_s9 }
 0x655   : > { %v788_v1 = vpop.f32.mrb[14].mxu0  ;;  %p1391_p7 = scmp.lt.s32.totalorder %s1810_s13, %s1389_s9 }
 0x656   : > { %v1175_v2 = vpop.f32.mrb[15].mxu0  ;;  %v833_v3 = vpop.f32.mrb[12].mxu1 }
 0x657   : > { %892 = vrot.lane.b32.xlu1 %v833_v3, %s1470_s21  ;;  %v1180_v4 = vpop.f32.mrb[13].mxu1  ;;  %s1390_s21 = scalar_lea.vmem %s1389_s9, 256 }
 0x658   : > { %v836_v5 = vpop.f32.mrb[14].mxu1  ;;  %p1392_p9 = scmp.lt.s32.totalorder %s1390_s21, %s1384_s14 }
 0x659   : > { %v1181_v6 = vpop.f32.mrb[15].mxu1 }
 0x65a   : > { %p1393_p12 = por %p1392_p9, %p1391_p7 }
 0x65b   : > { %v881_v7 = vpop.f32.mrb[16].mxu0 }
 0x65c   : > { %896 = vrot.lane.b32.xlu0 %v881_v7, %s1471_s22  ;;  %v1186_v8 = vpop.f32.mrb[17].mxu0  ;;  %p1394_p2 = pnand %p1393_p12, %p1387_p3 }
 0x65d   : > { %v884_v9 = vpop.f32.mrb[18].mxu0 }
 0x65e   : > { %v1187_v10 = vpop.f32.mrb[19].mxu0 }
 0x6c6   : > { %v889_v11 = vpop.permute.xlu0 %888 }
 0x6c7   : > { %v899_v13 = vsel %vm444_vm2, %v737_v56, %v889_v11 }
 0x6c9   : > { %v893_v12 = vpop.permute.xlu1 %892 }
 0x6ca   : > { %v901_v14 = vsel %vm900_vm5, %v899_v13, %v893_v12 }
 0x6ce   : > { %v897_v15 = vpop.permute.xlu0 %896 }
 0x6cf   : > { %v903_v16 = vsel %vm902_vm6, %v901_v14, %v897_v15 }
 0x6d0   : > { %v904_v17 = vpack.c.bf16 %v903_v16, %v903_v16 }
 0x6d2   : > { %1193 = vmatmul.mubr.msk.bf16.vlgmr.msra.gmra.mrb[16].mxu1 %vm325_vm0, %v904_v17 }
 0x7a5   : > { %v965_v19 = vpop.f32.mrb[16].mxu1 }
 0x7a6   : > { %v966_v20 = vadd.f32 %v1102_v18, %v965_v19  ;;  %v1194_v21 = vpop.f32.mrb[17].mxu1 }
 0x7a7   : > { %v968_v22 = vpop.f32.mrb[18].mxu1 }
 0x7a8   : > { %v971_v23 = vadd.f32 %v966_v20, %v1697_v0  ;;  %v1195_v24 = vpop.f32.mrb[19].mxu1 }
 0x7aa   : > { %972 = vst.msk [vmem:[%s320_s11] sm:$0xff] %vm325_vm0, %v971_v23 }
 0x7ab   : > { %1397 = shalt.err (!%p1394_p2)
}
 0x7ac   : > { %s1398_s12 = scalar_lea.hbm %s1808_s20, 128  ;;  %s1402_s29 = scalar_lea.hbm %s1860_s7, 256 }
 0x7ad   : > { %p1399_p13 = scmp.ne.s32.totalorder %s1808_s20, %s1398_s12  ;;  %p1403_p4 = scmp.lt.u32.totalorder %s1808_s20, %s1860_s7 }
 0x7ae   : > { %p1404_p5 = scmp.lt.u32.totalorder %s1402_s29, %s1398_s12  ;;  %p1406_p11 = scmp.lt.u32.totalorder %s1398_s12, %s1808_s20 }
 0x7af   : > { %p1400_p6 = pnand %p1399_p13, %p1874_p0 }
 0x7b0   : > { %p1405_p8 = por %p1404_p5, %p1403_p4 }
 0x7b1   : > { %p1401_p10 = pneg %p1400_p6 }
 0x7b2   : > { %p1407_p1 = por %p1406_p11, %p1405_p8 }
 0x7b4   : > { %p1408_p3 = pnand %p1407_p1, %p1401_p10 }
 0x7b6   : > { %1411 = shalt.err (!%p1408_p3)
}
 0x7b7   : > { %1206 = dma.vmem_to_hbm [thread:$0]  (%p1874_p0), %s1810_s13, 128, %s1808_s20, %s974_s28  }
 0x7b8 PF: > { %s999_s18 = sand.u32 1, %s1442_s24   ;;  %p1875_p7 = scmp.ne.s32.totalorder %s1865_s8, 0 }
 0x7b9   : > { %p1876_p9 = scmp.ge.s32.totalorder %s1454_s27, 2  ;;  %s1000_s19 = scalar_lea.sflag [#allocation4], %s999_s18 }
 0x7bb   : > { %p1220_p12 = pnand %p1876_p9, %p1875_p7 }
 0x7bd   : > { %1437 = dma.done.wait (!%p1220_p12), %s1000_s19, 128  }
 0x7be   : > { %1439 = vsyncadd (!%p1220_p12), %s1000_s19, 4294967168  ;;  %p21_p2 = scmp.ge.s32.totalorder %s1624_s10, 4   ;;  %s1877_s24 = smov %s1446_s25 }
 0x7bf   : > { %s1878_s25 = smov %s1450_s26  ;;  %s1879_s26 = smov %s1640_s16 }
 0x7c0   : > { %s1880_s27 = smov %s1624_s10  ;;  %23 = sbr.rel (!%p21_p2) target bundleno = 6 (0x6), region = 101 }
 0x7c7   :  { %1005 = vsyncpa [#allocation3], 1 }
 0x7c8   :  { %1007 = vsyncpa [#allocation3 + $0x1], 1 }
 0x7c9   :  { %1008 = vsyncpa [#allocation6], 1 }
 0x7ca   :  { %1009 = vsyncpa [#allocation4], 1 }
 0x7cb   :  { %1011 = vsyncpa [#allocation4 + $0x1], 1 }

</bundles_post_ra>
